<compile_context>
chip_gen: v7x
topology: tpu7x:2x2x1
jax: 0.10.0
libtpu: 0.0.40
codegen_flags: <defaults>
</compile_context>

<pallas_src>
import functools

import jax
import jax.numpy as jnp
from jax import lax
from jax.experimental import pallas as pl
from jax.experimental.pallas import tpu as pltpu


def _center_loss_kernel(x_ref, labels_ref, centers_ref, out_ref, *,
                        tile_rows, num_classes, actual_batch):
    """One grid step = one tile of `tile_rows` (padded) batch rows.

    x_ref      : VMEM (tile_rows, D)   features for this tile
    labels_ref : VMEM (tile_rows, 1)   int32 labels for this tile
    centers_ref: VMEM (C, D)           full center table (resident)
    out_ref    : VMEM (8, 128)         per-tile partial sum (broadcast-filled)
    """
    x = x_ref[...].astype(jnp.float32)                         # (T, D)
    centers = centers_ref[...].astype(jnp.float32)             # (C, D)
    labels = labels_ref[...]                                    # (T, 1) int32

    # Vectorized gather of centers[labels] via one-hot matmul on the MXU.
    # (Assumes labels in [0, C), same as the PyTorch reference.)
    class_ids = lax.broadcasted_iota(jnp.int32, (tile_rows, num_classes), 1)
    one_hot = (labels == class_ids).astype(jnp.float32)         # (T, C)
    c = jnp.dot(one_hot, centers,
                preferred_element_type=jnp.float32)             # (T, D)

    # Fused squared distance ||x - c||^2.
    d = x - c
    dist = jnp.sum(d * d, axis=1, keepdims=True)                # (T, 1)
    clipped = jnp.clip(dist, 1e-12, 1e12)

    # Mask padded batch rows so they contribute exactly 0.
    base = pl.program_id(0) * tile_rows
    row_ids = base + lax.broadcasted_iota(jnp.int32, (tile_rows, 1), 0)
    clipped = jnp.where(row_ids < actual_batch, clipped, 0.0)

    partial = jnp.sum(clipped, axis=0, keepdims=True)           # (1, 1)
    # Lane-dense full-block store (no masked partial stores).
    out_ref[...] = jnp.broadcast_to(partial, (8, 128))


def _round_up(v, m):
    return ((v + m - 1) // m) * m


def center_loss(x, centers, labels, *, tile_rows=None):
    """x: (B, D) float, centers: (C, D) float, labels: (B,) int -> scalar f32."""
    B, D = x.shape
    C, Dc = centers.shape
    assert D == Dc

    if tile_rows is None:
        # Large tiles amortize the ~0.35us/grid-step overhead; always a
        # multiple of 8 so blocks satisfy the (8,128) sublane rule.
        tile_rows = min(512, _round_up(B, 8))
    tile_rows = _round_up(tile_rows, 8)

    B_pad = _round_up(B, tile_rows)
    num_tiles = B_pad // tile_rows

    labels_i32 = labels.astype(jnp.int32)
    x_f = x
    if B_pad != B:
        x_f = jnp.zeros((B_pad, D), x.dtype).at[:B].set(x)
        labels_i32 = jnp.zeros((B_pad,), jnp.int32).at[:B].set(labels_i32)
    labels_2d = labels_i32.reshape(B_pad, 1)

    kernel = functools.partial(_center_loss_kernel, tile_rows=tile_rows,
                               num_classes=C, actual_batch=B)

    # TODO(synk): for very large num_classes (C*D beyond ~16-24 MiB), stream
    # centers from HBM via label-driven make_async_copy row gathers instead of
    # keeping the (double-buffered) table VMEM-resident.
    out = pl.pallas_call(
        kernel,
        out_shape=jax.ShapeDtypeStruct((8, 128 * num_tiles), jnp.float32),
        grid_spec=pltpu.PrefetchScalarGridSpec(
            num_scalar_prefetch=0,
            grid=(num_tiles,),
            in_specs=[
                pl.BlockSpec((tile_rows, D), lambda i: (i, 0)),   # x tile
                pl.BlockSpec((tile_rows, 1), lambda i: (i, 0)),   # labels tile
                pl.BlockSpec((C, D), lambda i: (0, 0)),           # centers (resident)
            ],
            out_specs=pl.BlockSpec((8, 128), lambda i: (0, i)),
        ),
        compiler_params=pltpu.CompilerParams(
            dimension_semantics=("parallel",),       # independent batch tiles
            vmem_limit_bytes=48 * 1024 * 1024,       # headroom on v7x (64 MiB)
        ),
    )(x_f, labels_2d, centers)

    # Each (8,128) block holds one tile's partial sum broadcast everywhere.
    partials = out[0, 0::128]                                    # (num_tiles,)
    # Every masked-out (b, c) entry of the reference contributes exactly
    # clamp(0, 1e-12, 1e12) = 1e-12; there are B*(C-1) of them.
    masked_out = jnp.float32(B) * jnp.float32(C - 1) * jnp.float32(1e-12)
    return (jnp.sum(partials) + masked_out) / jnp.float32(B)


def center_loss_ref(x, centers, labels):
    """Pure-JAX reference mirroring the PyTorch forward (full distmat)."""
    B = x.shape[0]
    C = centers.shape[0]
    distmat = (jnp.sum(x**2, axis=1, keepdims=True)
               + jnp.sum(centers**2, axis=1, keepdims=True).T
               - 2.0 * x @ centers.T)
    mask = (labels[:, None] == jnp.arange(C)[None, :]).astype(jnp.float32)
    dist = distmat * mask
    return jnp.sum(jnp.clip(dist, 1e-12, 1e12)) / B


if __name__ == "__main__":
    num_classes = 10
    feat_dim = 2
    batch_size = 8

    key = jax.random.PRNGKey(0)
    k_centers, k_x, k_lab = jax.random.split(key, 3)

    # Deterministic "parameter" init matching torch.randn(num_classes, feat_dim).
    centers = jax.random.normal(k_centers, (num_classes, feat_dim), jnp.float32)
    x = jax.random.normal(k_x, (batch_size, feat_dim), jnp.float32)
    labels = jax.random.randint(k_lab, (batch_size,), 0, num_classes, jnp.int32)

    loss = jax.block_until_ready(center_loss(x, centers, labels))
    loss_ref = jax.block_until_ready(center_loss_ref(x, centers, labels))

    assert jnp.allclose(loss, loss_ref, rtol=1e-5, atol=1e-5), (loss, loss_ref)
    print("KERNEL_OK")
</pallas_src>

<mosaic_0001>
module attributes {stable_mosaic.version = 11 : i64} {
  func.func @_center_loss_kernel(%arg0: i32, %arg1: memref<8x2xf32, #tpu.memory_space<vmem>>, %arg2: memref<8x1xi32, #tpu.memory_space<vmem>>, %arg3: memref<10x2xf32, #tpu.memory_space<vmem>>, %arg4: memref<8x128xf32, #tpu.memory_space<vmem>>) attributes {dimension_semantics = [#tpu.dimension_semantics<parallel>], iteration_bounds = array<i64: 1>, scalar_prefetch = 0 : i64, scratch_operands = 0 : i64, tpu.core_type = #tpu.core_type<tc>, window_params = [{transform_indices = @transform_0, window_bounds = array<i64: 8, 2>}, {transform_indices = @transform_1, window_bounds = array<i64: 8, 1>}, {pipeline_mode = #tpu.pipeline_mode<synchronous>, transform_indices = @transform_2, window_bounds = array<i64: 10, 2>}, {transform_indices = @transform_3, window_bounds = array<i64: 8, 128>}]} {
    %c0 = arith.constant 0 : index
    %c0_0 = arith.constant 0 : index
    %0 = vector.load %arg1[%c0, %c0_0] : memref<8x2xf32, #tpu.memory_space<vmem>>, vector<8x2xf32>
    %c0_1 = arith.constant 0 : index
    %c0_2 = arith.constant 0 : index
    %1 = vector.load %arg3[%c0_1, %c0_2] : memref<10x2xf32, #tpu.memory_space<vmem>>, vector<10x2xf32>
    %c0_3 = arith.constant 0 : index
    %c0_4 = arith.constant 0 : index
    %2 = vector.load %arg2[%c0_3, %c0_4] : memref<8x1xi32, #tpu.memory_space<vmem>>, vector<8x1xi32>
    %3 = tpu.iota {dimensions = array<i32: 1>} : vector<8x10xi32>
    %4 = vector.broadcast %2 : vector<8x1xi32> to vector<8x10xi32>
    %5 = arith.cmpi eq, %4, %3 : vector<8x10xi32>
    %6 = arith.extui %5 : vector<8x10xi1> to vector<8x10xi32>
    %7 = arith.sitofp %6 : vector<8x10xi32> to vector<8x10xf32>
    %cst = arith.constant dense<0.000000e+00> : vector<8x2xf32>
    %8 = tpu.matmul %7, %1, %cst {dimension_numbers = #tpu.dot_dimension_numbers<[1], [0], [0], [1], [0, 0, 1, 1], [], []>} : vector<8x10xf32>, vector<10x2xf32>, vector<8x2xf32> -> vector<8x2xf32>
    %9 = arith.subf %0, %8 : vector<8x2xf32>
    %10 = arith.mulf %9, %9 : vector<8x2xf32>
    %cst_5 = arith.constant dense<0.000000e+00> : vector<8xf32>
    %11 = vector.multi_reduction <add>, %10, %cst_5 [1] : vector<8x2xf32> to vector<8xf32>
    %12 = vector.shape_cast %11 : vector<8xf32> to vector<8x1xf32>
    %cst_6 = arith.constant 9.99999996E-13 : f32
    %cst_7 = arith.constant 9.99999995E+11 : f32
    %13 = vector.broadcast %cst_6 : f32 to vector<8x1xf32>
    %14 = arith.maximumf %13, %12 : vector<8x1xf32>
    %15 = vector.broadcast %cst_7 : f32 to vector<8x1xf32>
    %16 = arith.minimumf %15, %14 : vector<8x1xf32>
    %c8_i32 = arith.constant 8 : i32
    %17 = arith.muli %arg0, %c8_i32 : i32
    %18 = tpu.iota {dimensions = array<i32: 0>} : vector<8x1xi32>
    %19 = vector.broadcast %17 : i32 to vector<8x1xi32>
    %20 = arith.addi %19, %18 : vector<8x1xi32>
    %c8_i32_8 = arith.constant 8 : i32
    %21 = vector.broadcast %c8_i32_8 : i32 to vector<8x1xi32>
    %22 = arith.cmpi slt, %20, %21 : vector<8x1xi32>
    %cst_9 = arith.constant 0.000000e+00 : f32
    %23 = vector.broadcast %cst_9 : f32 to vector<8x1xf32>
    %24 = arith.select %22, %16, %23 : vector<8x1xi1>, vector<8x1xf32>
    %cst_10 = arith.constant dense<0.000000e+00> : vector<1xf32>
    %25 = vector.multi_reduction <add>, %24, %cst_10 [0] : vector<8x1xf32> to vector<1xf32>
    %26 = vector.shape_cast %25 : vector<1xf32> to vector<1x1xf32>
    %27 = vector.shape_cast %26 : vector<1x1xf32> to vector<1x1xf32>
    %28 = vector.broadcast %27 : vector<1x1xf32> to vector<8x128xf32>
    %c0_11 = arith.constant 0 : index
    %c0_12 = arith.constant 0 : index
    %29 = vector.load %arg4[%c0_11, %c0_12] : memref<8x128xf32, #tpu.memory_space<vmem>>, vector<8x128xf32>
    tpu.vector_store %arg4[%c0_11, %c0_12], %28 {strides = array<i32>} : memref<8x128xf32, #tpu.memory_space<vmem>>, vector<8x128xf32>,
    return
  }
  func.func @transform_0(%arg0: i32) -> (i32, i32) {
    %c0_i32 = arith.constant 0 : i32
    %c0_i32_0 = arith.constant 0 : i32
    return %arg0, %c0_i32 : i32, i32
  }
  func.func @transform_1(%arg0: i32) -> (i32, i32) {
    %c0_i32 = arith.constant 0 : i32
    %c0_i32_0 = arith.constant 0 : i32
    return %arg0, %c0_i32 : i32, i32
  }
  func.func @transform_2(%arg0: i32) -> (i32, i32) {
    %c0_i32 = arith.constant 0 : i32
    %c0_i32_0 = arith.constant 0 : i32
    %c0_i32_1 = arith.constant 0 : i32
    return %c0_i32, %c0_i32_0 : i32, i32
  }
  func.func @transform_3(%arg0: i32) -> (i32, i32) {
    %c0_i32 = arith.constant 0 : i32
    %c0_i32_0 = arith.constant 0 : i32
    return %c0_i32, %arg0 : i32, i32
  }
}

</mosaic_0001>

<bundles_post_ra>
// kernel: tpu_custom_call.1
= control target key start
LH: loop header
LB: loop body
LE: loop exit
PB: predicated region body
PF: predicated region fallthrough
CT: control target
= control target key end

     0   :  { %v189_v3 = vmov 0   ;;  %v190_v4 = vmov 0.0|0.0   ;;  %vm31_vm0 = vcmask 1041408   ;;  %s239_s0 = inlined_call_operand.vmem [shape: f32[8,2], index: 0, kind: input, shape index: {}]   ;;  %s240_s1 = inlined_call_operand.vmem [shape: s32[8,1], index: 1, kind: input, shape index: {}]   ;;  %s241_s2 = inlined_call_operand.vmem [shape: f32[10,2], index: 2, kind: input, shape index: {}]   ;;  %s242_s3 = inlined_call_operand.hbm [shape: f32[8,128], index: 3, kind: output, shape index: {}]  }
   0x1   :  { %v18_v0 = vld [vmem:[%s240_s1] sm:$0xff]  ;;  %v17_v2 = vld [vmem:[%s241_s2 + $0x8] sm:$0x3]  ;;  %164 = vset.pattern.permute.xlu0 %v189_v3  ;;  %154 = vmatprep.subr.bf16.mxu0 %v190_v4 }
   0x2   :  { %v16_v1 = vld [vmem:[%s241_s2] sm:$0xff] }
   0x3   :  { %v155_v5 = vpack.c.bf16 %v17_v2, %v16_v1 }
   0x4   :  { %8 = vsyncpa [#allocation3], 0  ;;  %22 = vperm.xlu0 %164, %v18_v0   ;;  %vm191_vm1 = vmmov 1   ;;  %vm192_vm3 = vmmov 0   ;;  %v193_v6 = vmov 0.0   ;;  %v19_v7 = vlaneseq  ;;  %v15_v11 = vld [vmem:[%s239_s0] sm:$0xff] }
   0x5   :  { %vm156_vm2 = vmpackc.low %vm31_vm0, %vm191_vm1  ;;  %151 = vmatprep.mubr.msk.f32.mxu0 %vm192_vm3, %v193_v6  ;;  %vm27_vm4 = vcmask 80896   ;;  %vm107_vm6 = vcmask 15360   ;;  %s194_s18 = smov [#allocation2]  }
   0x6   :  { %157 = vmatpush3.bf16.msk.msra.mxu0 %vm156_vm2, %v155_v5  ;;  %v20_v8 = vand.u32 127, %v19_v7  ;;  %s133_s19 = sshll.u32 %s194_s18, 4  ;;  %s134_s19 = int_to_ptr.vmem [resolvable:$true] %s133_s19 }
   0x7   :  { %s165_s0 = scalar_lea.vmem %s134_s19, 128  ;;  %p170_p1 = scmp.lt.s32.totalorder %s134_s19, %s134_s19 }
   0x8   :  { %p166_p0 = scmp.ne.s32.totalorder %s134_s19, %s165_s0  ;;  %p171_p2 = scmp.lt.s32.totalorder %s165_s0, %s165_s0 }
   0xa   :  { %p172_p3 = por %p171_p2, %p170_p1 }
   0xc   :  { %p173_p4 = pnand %p172_p3, %p166_p0 }
  0x83   :  { %v23_v9 = vpop.permute.xlu0 %22 }
  0x84   :  { %vm24_vm5 = vcmp.eq.s32.totalorder %v23_v9, %v20_v8 }
  0x85   :  { %v141_v10 = vsel %vm24_vm5, 1.0, %v193_v6 }
  0x86   :  { %152 = vmatmul.mubr.msk.f32.vlgmr.msra.gmra.mrb[0].mxu0 %vm27_vm4, %v141_v10 }
 0x159   :  { %v101_v12 = vpop.f32.mrb[0].mxu0 }
 0x15a   :  { %v105_v13 = vsub.f32 %v15_v11, %v101_v12  ;;  %v153_v14 = vpop.f32.mrb[1].mxu0 }
 0x15c   :  { %v106_v15 = vmul.f32 %v105_v13, %v105_v13 }
 0x15e   :  { %v108_v16 = vsel %vm107_vm6, %v106_v15, 0.0 }
 0x15f   :  { %109 = vadd.xlane.f32.xlu0 %v108_v16 }
 0x1ec   :  { %v110_v17 = vpop.xlane.xlu0 %109 }
 0x1ed   :  { %v111_v18 = vmax.f32 %v110_v17, 1e-12 }
 0x1ef   :  { %v112_v19 = vmin.f32 %v111_v18, 1e+12 }
 0x1f1   :  { %v120_v20 = vrot.slane %v112_v19, 4 }
 0x1f3   :  { %v121_v21 = vadd.f32 %v120_v20, %v112_v19 }
 0x1f5   :  { %v122_v22 = vrot.slane %v121_v21, 2 }
 0x1f7   :  { %v123_v23 = vadd.f32 %v122_v22, %v121_v21 }
 0x1f9   :  { %v124_v24 = vrot.slane %v123_v23, 1 }
 0x1fb   :  { %v125_v25 = vadd.f32 %v124_v24, %v123_v23 }
 0x1fd   :  { %126 = vst [vmem:[#allocation2] sm:$0xff] %v125_v25 }
 0x1fe   :  { %176 = shalt.err (!%p173_p4)
}
 0x1ff   :  { %s177_s22 = scalar_lea.hbm %s242_s3, 128 }
 0x200   :  { %p178_p5 = scmp.ne.s32.totalorder %s242_s3, %s177_s22  ;;  %p181_p6 = scmp.lt.u32.totalorder %s177_s22, %s242_s3 }
 0x202   :  { %p183_p7 = pnand %p181_p6, %p178_p5 }
 0x204   :  { %186 = shalt.err (!%p183_p7)
}
 0x205   :  { %136 = dma.vmem_to_hbm [thread:$0]  %s134_s19, 128, %s242_s3, [#allocation3]  }
 0x206   :  { %187 = dma.done.wait [#allocation3], 128  }
 0x207   :  { %188 = vsyncadd [#allocation3], 4294967168 }
 0x208   :  { %140 = vsyncpa [#allocation3], 1 }

</bundles_post_ra>
